<compile_context>
chip_gen: v7x
topology: tpu7x:2x2x1
jax: 0.10.0
libtpu: 0.0.40
codegen_flags: <defaults>
</compile_context>

<pallas_src>
import numpy as np
import jax
import jax.numpy as jnp
from jax.experimental import pallas as pl
from jax.experimental.pallas import tpu as pltpu

# Safe on every generation: v5e/v6e have 128 MiB physical VMEM, v7x only 64 MiB.
_VMEM_LIMIT = 48 * 1024 * 1024


# ---------------------------------------------------------------------------
# Pallas kernels
# ---------------------------------------------------------------------------
def _matmul_bn_relu_kernel(x_ref, w_ref, shift_ref, o_ref, acc_ref):
    """One (tm, tn) output tile of conv-as-matmul, accumulated over the K grid axis.

    x: (tm, tk) bf16      w: (tk, tn) bf16 (BN scale pre-folded)
    shift: (1, tn) f32    o: (tm, tn) f32      acc: (tm, tn) f32 scratch
    """
    @pl.when(pl.program_id(2) == 0)
    def _():
        acc_ref[...] = jnp.zeros_like(acc_ref)

    acc_ref[...] += jnp.dot(x_ref[...], w_ref[...],
                            preferred_element_type=jnp.float32)

    @pl.when(pl.program_id(2) == pl.num_programs(2) - 1)
    def _():
        o_ref[...] = jnp.maximum(acc_ref[...] + shift_ref[...], 0.0)


def _upsample_kernel(ah_ref, mw_ref, x_ref, o_ref):
    """Fused separable bilinear upsample for one batch element.

    ah: (Ho, Hi)        row (H) interpolation matrix
    mw: (Wi*C, Wo*C)    kron(Aw^T, I_C)  -> column (W) interpolation as a plain
                        right-matmul on the flattened lane axis (no in-kernel
                        transposes / lane-splitting reshapes needed)
    x : (1, Hi, Wi*C)   input, channels fastest on lanes
    o : (1, Ho, Wo*C)
    """
    t = jnp.dot(ah_ref[...], x_ref[0], preferred_element_type=jnp.float32)
    o_ref[0] = jnp.dot(t, mw_ref[...], preferred_element_type=jnp.float32)


# ---------------------------------------------------------------------------
# Tiling helper
# ---------------------------------------------------------------------------
def _choose_tile(total, target, quantum):
    """Largest divisor of `total` that is a multiple of `quantum` and <= target;
    falls back to the full extent (always a legal block) when none exists."""
    best = None
    upper = min(total, target)
    for cand in range(quantum, upper + 1, quantum):
        if total % cand == 0:
            best = cand
    return best if best is not None else total


# ---------------------------------------------------------------------------
# Fused 3x3 conv (pad=1, no bias) + folded BatchNorm + ReLU, optional stride
# ---------------------------------------------------------------------------
def conv3x3_bn_relu(x_nhwc, w_hwio, scale, shift, stride=1):
    """x: (B,H,W,Cin) f32; w: (3,3,Cin,Cout); scale/shift: (Cout,). -> (B,Ho,Wo,Cout)."""
    B, H, W, Cin = x_nhwc.shape
    Cout = w_hwio.shape[-1]
    Ho = (H + 2 - 3) // stride + 1
    Wo = (W + 2 - 3) // stride + 1
    K = 9 * Cin
    M = B * Ho * Wo

    # im2col glue in plain JAX; stride is baked in so no wasted rows are built.
    # TODO(synk): hoist the im2col into the kernel (accumulate 9 shifted-tap
    #   matmuls over a padded NHWC HBM ref) to remove the 9x activation
    #   intermediate entirely; bf16 + strided taps already reduce it a lot.
    xp = jnp.pad(x_nhwc, ((0, 0), (1, 1), (1, 1), (0, 0)))
    cols = [xp[:, dy:dy + stride * (Ho - 1) + 1:stride,
               dx:dx + stride * (Wo - 1) + 1:stride, :]
            for dy in range(3) for dx in range(3)]
    xcol = jnp.concatenate(cols, axis=-1).reshape(M, K).astype(jnp.bfloat16)

    # Fold BN scale into the weights; kernel epilogue is just "+shift, ReLU".
    wmat = (w_hwio.reshape(K, Cout).astype(jnp.float32)
            * scale.astype(jnp.float32)[None, :]).astype(jnp.bfloat16)
    shift2 = shift.reshape(1, Cout).astype(jnp.float32)

    tm = _choose_tile(M, 256, 8)          # spatial*batch tile
    tn = Cout if Cout <= 256 else 256     # 256-wide output tile for v6e/v7x MXU
    tk = _choose_tile(K, 1152, 128)       # reduction tile (falls back to full K)
    grid = (M // tm, Cout // tn, K // tk)

    out = pl.pallas_call(
        _matmul_bn_relu_kernel,
        out_shape=jax.ShapeDtypeStruct((M, Cout), jnp.float32),
        grid_spec=pltpu.PrefetchScalarGridSpec(
            num_scalar_prefetch=0,
            grid=grid,
            in_specs=[
                pl.BlockSpec((tm, tk), lambda m, c, k: (m, k)),
                pl.BlockSpec((tk, tn), lambda m, c, k: (k, c)),
                pl.BlockSpec((1, tn), lambda m, c, k: (0, c)),
            ],
            out_specs=pl.BlockSpec((tm, tn), lambda m, c, k: (m, c)),
            scratch_shapes=[pltpu.VMEM((tm, tn), jnp.float32)],
        ),
        compiler_params=pltpu.CompilerParams(
            dimension_semantics=("parallel", "parallel", "arbitrary"),
            vmem_limit_bytes=_VMEM_LIMIT,
        ),
    )(xcol, wmat, shift2)
    return out.reshape(B, Ho, Wo, Cout)


# ---------------------------------------------------------------------------
# Bilinear upsample (align_corners=True) — single fused Pallas kernel per batch
# ---------------------------------------------------------------------------
def _interp_matrix(n_out, n_in):
    if n_in == 1:
        return np.ones((n_out, 1), np.float32)
    if n_out == 1:
        # TODO(synk): degenerate output-size-1 differs slightly from PyTorch
        # align_corners semantics; unused in this model.
        A = np.zeros((1, n_in), np.float32)
        A[0, 0] = 1.0
        return A
    src = np.arange(n_out, dtype=np.float64) * (n_in - 1) / (n_out - 1)
    lo = np.clip(np.floor(src).astype(np.int64), 0, n_in - 1)
    hi = np.minimum(lo + 1, n_in - 1)
    frac = (src - lo).astype(np.float32)
    A = np.zeros((n_out, n_in), np.float32)
    A[np.arange(n_out), lo] += 1.0 - frac
    A[np.arange(n_out), hi] += frac
    return A


def upsample_bilinear_align(x_nhwc, out_hw):
    B, Hi, Wi, C = x_nhwc.shape
    Ho, Wo = out_hw
    Ah = jnp.asarray(_interp_matrix(Ho, Hi))
    # kron(Aw^T, I_C) turns the W-interpolation into a plain right matmul on the
    # flattened (Wi*C) lane axis -> everything in the kernel is a 2-D MXU matmul.
    # TODO(synk): for very large Wi*Wo this dense kron should be replaced by a
    #   channel-blocked transpose+matmul formulation.
    Mw = jnp.asarray(
        np.kron(_interp_matrix(Wo, Wi).T, np.eye(C, dtype=np.float32)))
    x2 = x_nhwc.reshape(B, Hi, Wi * C)

    out = pl.pallas_call(
        _upsample_kernel,
        out_shape=jax.ShapeDtypeStruct((B, Ho, Wo * C), jnp.float32),
        grid_spec=pltpu.PrefetchScalarGridSpec(
            num_scalar_prefetch=0,
            grid=(B,),
            in_specs=[
                pl.BlockSpec((Ho, Hi), lambda b: (0, 0)),
                pl.BlockSpec((Wi * C, Wo * C), lambda b: (0, 0)),
                pl.BlockSpec((1, Hi, Wi * C), lambda b: (b, 0, 0)),
            ],
            out_specs=pl.BlockSpec((1, Ho, Wo * C), lambda b: (b, 0, 0)),
        ),
        compiler_params=pltpu.CompilerParams(
            dimension_semantics=("parallel",),
            vmem_limit_bytes=_VMEM_LIMIT,
        ),
    )(Ah, Mw, x2)
    return out.reshape(B, Ho, Wo, C)


# ---------------------------------------------------------------------------
# Parameter construction (deterministic, synthetic; BN folded to scale/shift)
# ---------------------------------------------------------------------------
def make_conv_bn(key, cin, cout, eps=1e-5):
    kw, kg, kb, km, kv = jax.random.split(key, 5)
    w = jax.random.normal(kw, (3, 3, cin, cout), jnp.float32) / np.sqrt(9.0 * cin)
    gamma = 1.0 + 0.1 * jax.random.normal(kg, (cout,), jnp.float32)
    beta = 0.1 * jax.random.normal(kb, (cout,), jnp.float32)
    mean = 0.1 * jax.random.normal(km, (cout,), jnp.float32)
    var = 1.0 + 0.1 * jax.random.uniform(kv, (cout,), jnp.float32)
    scale = gamma / jnp.sqrt(var + eps)
    shift = beta - mean * scale
    return w, scale, shift


# ---------------------------------------------------------------------------
# Backbone stub (resnet101 + PSP is an external pretrained module)
# ---------------------------------------------------------------------------
def backbone_stub(x_nhwc, params):
    # TODO(synk): the real ResNet-101(dilated)+PSP backbone is an external,
    # pretrained module; each stage is stubbed with one Pallas conv3x3+BN+ReLU
    # producing the channel counts / strides DeepLabResnet.forward consumes.
    c1 = conv3x3_bn_relu(x_nhwc, *params["stem"], stride=2)   # (B, H/2, W/2,   64)
    l1 = conv3x3_bn_relu(c1, *params["layer1"], stride=2)     # (B, H/4, W/4,  256)
    l2 = conv3x3_bn_relu(l1, *params["layer2"], stride=2)     # (B, H/8, W/8,  512)
    l3 = conv3x3_bn_relu(l2, *params["layer3"])               # (B, H/8, W/8, 1024)
    l4 = conv3x3_bn_relu(l3, *params["layer4"])               # (B, H/8, W/8, 2048)
    l5 = conv3x3_bn_relu(l4, *params["layer5"])               # (B, H/8, W/8,  512)  (PSP out)
    return c1, l1, l2, l3, l4, l5


# ---------------------------------------------------------------------------
# DeepLabResnet forward (classifier='psp', update_last=False, use_final=True)
# ---------------------------------------------------------------------------
def deeplab_resnet_forward(x_nchw, params, final_resolution=(16, 16),
                           use_final=True, normalize_input=True):
    x = x_nchw.astype(jnp.float32)
    if normalize_input:
        mean = jnp.array([0.485, 0.456, 0.406], jnp.float32).reshape(1, 3, 1, 1)
        std = jnp.array([0.229, 0.224, 0.225], jnp.float32).reshape(1, 3, 1, 1)
        x = x.at[:, :3].set((x[:, :3] - mean) / std)

    x = jnp.transpose(x, (0, 2, 3, 1))                    # NCHW -> NHWC
    c1, l1, l2, _l3, l4, l5 = backbone_stub(x, params)

    def branch(feat, p):
        return upsample_bilinear_align(conv3x3_bn_relu(feat, *p), final_resolution)

    f1 = branch(c1, params["conv1_concat"])
    f2 = branch(l1, params["res1_concat"])
    f3 = branch(l2, params["res2_concat"])
    f4 = branch(l4, params["res4_concat"])
    f5 = branch(l5, params["res5_concat"])

    cat = jnp.concatenate([f1, f2, f3, f4, f5], axis=-1)  # channel concat (NHWC)
    final = conv3x3_bn_relu(cat, *params["final"]) if use_final else cat

    # back to NCHW to match the PyTorch module's outputs
    return jnp.transpose(final, (0, 3, 1, 2)), jnp.transpose(cat, (0, 3, 1, 2))


# ---------------------------------------------------------------------------
if __name__ == "__main__":
    key = jax.random.PRNGKey(0)
    kx, kp = jax.random.split(key)

    # Small shapes consistent with the module: batch=2, input_channel=3,
    # 32x32 input, final_resolution scaled down to (16,16).
    B, Cin, H, W = 2, 3, 32, 32
    concat_channels, final_dim = 64, 128
    final_resolution = (16, 16)

    x = jax.random.uniform(kx, (B, Cin, H, W), jnp.float32)

    keys = jax.random.split(kp, 12)
    params = {
        "stem":         make_conv_bn(keys[0], Cin, 64),
        "layer1":       make_conv_bn(keys[1], 64, 256),
        "layer2":       make_conv_bn(keys[2], 256, 512),
        "layer3":       make_conv_bn(keys[3], 512, 1024),
        "layer4":       make_conv_bn(keys[4], 1024, 2048),
        "layer5":       make_conv_bn(keys[5], 2048, 512),
        "conv1_concat": make_conv_bn(keys[6], 64, concat_channels),
        "res1_concat":  make_conv_bn(keys[7], 256, concat_channels),
        "res2_concat":  make_conv_bn(keys[8], 512, concat_channels),
        "res4_concat":  make_conv_bn(keys[9], 2048, concat_channels),
        "res5_concat":  make_conv_bn(keys[10], 512, concat_channels),
        "final":        make_conv_bn(keys[11], 5 * concat_channels, final_dim),
    }

    final_features, final_cat_features = deeplab_resnet_forward(
        x, params, final_resolution=final_resolution)
    jax.block_until_ready((final_features, final_cat_features))

    assert final_features.shape == (B, final_dim, *final_resolution)
    assert final_cat_features.shape == (B, 5 * concat_channels, *final_resolution)
    print("KERNEL_OK")
</pallas_src>

<mosaic_0001>
module attributes {stable_mosaic.version = 11 : i64} {
  func.func @_matmul_bn_relu_kernel(%arg0: i32, %arg1: i32, %arg2: i32, %arg3: memref<256x27xbf16, #tpu.memory_space<vmem>>, %arg4: memref<27x64xbf16, #tpu.memory_space<vmem>>, %arg5: memref<1x64xf32, #tpu.memory_space<vmem>>, %arg6: memref<256x64xf32, #tpu.memory_space<vmem>>, %arg7: memref<256x64xf32, #tpu.memory_space<vmem>>) attributes {dimension_semantics = [#tpu.dimension_semantics<parallel>, #tpu.dimension_semantics<parallel>, #tpu.dimension_semantics<arbitrary>], iteration_bounds = array<i64: 2, 1, 1>, scalar_prefetch = 0 : i64, scratch_operands = 1 : i64, tpu.core_type = #tpu.core_type<tc>, window_params = [{transform_indices = @transform_0, window_bounds = array<i64: 256, 27>}, {transform_indices = @transform_1, window_bounds = array<i64: 27, 64>}, {transform_indices = @transform_2, window_bounds = array<i64: 1, 64>}, {transform_indices = @transform_3, window_bounds = array<i64: 256, 64>}]} {
    %c0_i32 = arith.constant 0 : i32
    %0 = arith.cmpi eq, %arg2, %c0_i32 : i32
    %1 = arith.extui %0 : i1 to i32
    %c0_i32_0 = arith.constant 0 : i32
    %2 = arith.cmpi ne, %1, %c0_i32_0 : i32
    scf.if %2 {
      %cst_10 = arith.constant 0.000000e+00 : f32
      %12 = vector.broadcast %cst_10 : f32 to vector<256x64xf32>
      %c0_11 = arith.constant 0 : index
      %c0_12 = arith.constant 0 : index
      %13 = vector.load %arg7[%c0_11, %c0_12] : memref<256x64xf32, #tpu.memory_space<vmem>>, vector<256x64xf32>
      tpu.vector_store %arg7[%c0_11, %c0_12], %12 {strides = array<i32>} : memref<256x64xf32, #tpu.memory_space<vmem>>, vector<256x64xf32>,
    } else {
    }
    %c0 = arith.constant 0 : index
    %c0_1 = arith.constant 0 : index
    %3 = vector.load %arg7[%c0, %c0_1] : memref<256x64xf32, #tpu.memory_space<vmem>>, vector<256x64xf32>
    %c0_2 = arith.constant 0 : index
    %c0_3 = arith.constant 0 : index
    %4 = vector.load %arg3[%c0_2, %c0_3] : memref<256x27xbf16, #tpu.memory_space<vmem>>, vector<256x27xbf16>
    %c0_4 = arith.constant 0 : index
    %c0_5 = arith.constant 0 : index
    %5 = vector.load %arg4[%c0_4, %c0_5] : memref<27x64xbf16, #tpu.memory_space<vmem>>, vector<27x64xbf16>
    %cst = arith.constant dense<0.000000e+00> : vector<256x64xf32>
    %6 = tpu.matmul %4, %5, %cst {dimension_numbers = #tpu.dot_dimension_numbers<[1], [0], [0], [1], [0, 0, 1, 1], [], []>} : vector<256x27xbf16>, vector<27x64xbf16>, vector<256x64xf32> -> vector<256x64xf32>
    %7 = arith.addf %3, %6 : vector<256x64xf32>
    %c0_6 = arith.constant 0 : index
    %c0_7 = arith.constant 0 : index
    %8 = vector.load %arg7[%c0_6, %c0_7] : memref<256x64xf32, #tpu.memory_space<vmem>>, vector<256x64xf32>
    tpu.vector_store %arg7[%c0_6, %c0_7], %7 {strides = array<i32>} : memref<256x64xf32, #tpu.memory_space<vmem>>, vector<256x64xf32>,
    %c0_i32_8 = arith.constant 0 : i32
    %9 = arith.cmpi eq, %arg2, %c0_i32_8 : i32
    %10 = arith.extui %9 : i1 to i32
    %c0_i32_9 = arith.constant 0 : i32
    %11 = arith.cmpi ne, %10, %c0_i32_9 : i32
    scf.if %11 {
      %c0_10 = arith.constant 0 : index
      %c0_11 = arith.constant 0 : index
      %12 = vector.load %arg7[%c0_10, %c0_11] : memref<256x64xf32, #tpu.memory_space<vmem>>, vector<256x64xf32>
      %c0_12 = arith.constant 0 : index
      %c0_13 = arith.constant 0 : index
      %13 = vector.load %arg5[%c0_12, %c0_13] : memref<1x64xf32, #tpu.memory_space<vmem>>, vector<1x64xf32>
      %14 = vector.broadcast %13 : vector<1x64xf32> to vector<256x64xf32>
      %15 = arith.addf %12, %14 : vector<256x64xf32>
      %cst_14 = arith.constant 0.000000e+00 : f32
      %16 = vector.broadcast %cst_14 : f32 to vector<256x64xf32>
      %17 = arith.maximumf %15, %16 : vector<256x64xf32>
      %c0_15 = arith.constant 0 : index
      %c0_16 = arith.constant 0 : index
      %18 = vector.load %arg6[%c0_15, %c0_16] : memref<256x64xf32, #tpu.memory_space<vmem>>, vector<256x64xf32>
      tpu.vector_store %arg6[%c0_15, %c0_16], %17 {strides = array<i32>} : memref<256x64xf32, #tpu.memory_space<vmem>>, vector<256x64xf32>,
    } else {
    }
    return
  }
  func.func @transform_0(%arg0: i32, %arg1: i32, %arg2: i32) -> (i32, i32) {
    %c0_i32 = arith.constant 0 : i32
    return %arg0, %arg2 : i32, i32
  }
  func.func @transform_1(%arg0: i32, %arg1: i32, %arg2: i32) -> (i32, i32) {
    %c0_i32 = arith.constant 0 : i32
    return %arg2, %arg1 : i32, i32
  }
  func.func @transform_2(%arg0: i32, %arg1: i32, %arg2: i32) -> (i32, i32) {
    %c0_i32 = arith.constant 0 : i32
    %c0_i32_0 = arith.constant 0 : i32
    return %c0_i32, %arg1 : i32, i32
  }
  func.func @transform_3(%arg0: i32, %arg1: i32, %arg2: i32) -> (i32, i32) {
    %c0_i32 = arith.constant 0 : i32
    return %arg0, %arg1 : i32, i32
  }
}

</mosaic_0001>

<bundles_post_ra>
// kernel: tpu_custom_call.1
= control target key start
LH: loop header
LB: loop body
LE: loop exit
PB: predicated region body
PF: predicated region fallthrough
CT: control target
= control target key end

     0   :  { %s1183_s12 = smov 0   ;;  %s1185_s13 = smov 0   ;;  %s1440_s0 = inlined_call_operand.vmem [shape: bf16[512,27], index: 0, kind: input, shape index: {}]   ;;  %s1441_s1 = inlined_call_operand.vmem [shape: bf16[27,64], index: 1, kind: input, shape index: {}]   ;;  %s1442_s2 = inlined_call_operand.vmem [shape: f32[1,64], index: 2, kind: input, shape index: {}]   ;;  %s1443_s3 = inlined_call_operand.vmem [shape: f32[512,64], index: 3, kind: output, shape index: {}]  }
   0x1   :  { %s1187_s14 = smov 0  }
   0x2 LB: > { %s32_s15 = sadd.s32 1, %s1155_s13  ;;  %p993_p0 = scmp.ge.s32.totalorder %s1159_s14, 1  ;;  %s1159_s14 = sphi %s1187_s14, %s13_s14   ;;  %s1155_s13 = sphi %s1185_s13, %s1446_s13   ;;  %s1151_s12 = sphi %s1183_s12, %s1445_s12  }
   0x3   : > { %p34_p1 = scmp.ge.s32.totalorder %s32_s15, 2  ;;  %p188_p2 = scmp.lt.s32.totalorder %s1159_s14, 3 }
   0x5   : > { %s1448_s15 = smov (%p34_p1, %s32_s15), 0  ;;  %p189_p3 = pnand %p993_p0, %p188_p2 }
   0x6   : > { %v1119_v0 = vld [vmem:[%s1441_s1] sm:$0xff] (!%p189_p3)   ;;  %vm505_vm0 = vcmask (!%p189_p3), 1044480   ;;  %v1120_v1 = vld [vmem:[%s1441_s1 + $0x8] sm:$0x3f] (!%p189_p3)   ;;  %vm506_vm1 = vcmask (!%p189_p3), 1045504   ;;  %s994_s20 = sshll.u32 (!%p189_p3), %s1151_s12, 5 }
   0x7   : > { %192 = sbr.rel (%p189_p3) target bundleno = 275 (0x113), region = 32  ;;  %1053 = vmatprep.subr.bf16.mxu0 (!%p189_p3), %v1119_v0  ;;  %1089 = vmatprep.subr.bf16.mxu1 (!%p189_p3), %v1119_v0  ;;  %vm264_vm2 = vcmask (!%p189_p3), 523264   ;;  %v1161_v2 = vmov (!%p189_p3), 65535   ;;  %p1212_p4 = scmp.lt.s32.totalorder (!%p189_p3), %s994_s20, 63  ;;  %v1162_v5 = vmov (!%p189_p3), 0.0   ;;  %vm456_vm3 = vcmask (!%p189_p3), 220160  }
   0x8   : > { %1054 = vmatpush3.bf16.msra.mxu0 (!%p189_p3), %v1119_v0  ;;  %1091 = vmatpush3.bf16.msra.mxu1 (!%p189_p3), %v1119_v0  ;;  %v507_v3 = vsel (!%p189_p3), %vm505_vm0, 4294967295, %v1161_v2  ;;  %267 = vst.msk [vmem:[#allocation2 + $0x10] sm:$0xff] (!%p189_p3), %vm264_vm2, %v1162_v5  ;;  %265 = vst.msk [vmem:[#allocation2] sm:$0xff] (!%p189_p3), %vm264_vm2, %v1162_v5  ;;  %v1303_v50 = vld [vmem:[%s1442_s2] ss:$0 sm:$0xff] (!%p189_p3) }
   0x9   : > { %v508_v4 = vsel (!%p189_p3), %vm506_vm1, %v507_v3, 0  ;;  %266 = vst.msk [vmem:[#allocation2 + $0x8] sm:$0xff] (!%p189_p3), %vm264_vm2, %v1162_v5  ;;  %268 = vst.msk [vmem:[#allocation2 + $0x18] sm:$0xff] (!%p189_p3), %vm264_vm2, %v1162_v5 }
   0xa   : > { %269 = vst.msk [vmem:[#allocation2 + $0x20] sm:$0xff] (!%p189_p3), %vm264_vm2, %v1162_v5  ;;  %270 = vst.msk [vmem:[#allocation2 + $0x28] sm:$0xff] (!%p189_p3), %vm264_vm2, %v1162_v5  ;;  %v510_v6 = vand.u32 (!%p189_p3), %v1120_v1, %v508_v4 }
   0xb   : > { %271 = vst.msk [vmem:[#allocation2 + $0x30] sm:$0xff] (!%p189_p3), %vm264_vm2, %v1162_v5  ;;  %272 = vst.msk [vmem:[#allocation2 + $0x38] sm:$0xff] (!%p189_p3), %vm264_vm2, %v1162_v5 }
   0xc   : > { %273 = vst.msk [vmem:[#allocation2 + $0x40] sm:$0xff] (!%p189_p3), %vm264_vm2, %v1162_v5  ;;  %274 = vst.msk [vmem:[#allocation2 + $0x48] sm:$0xff] (!%p189_p3), %vm264_vm2, %v1162_v5  ;;  %1055 = vmatprep.subr.bf16.mxu0 (!%p189_p3), %v510_v6  ;;  %1090 = vmatprep.subr.bf16.mxu1 (!%p189_p3), %v510_v6 }
   0xd   : > { %275 = vst.msk [vmem:[#allocation2 + $0x50] sm:$0xff] (!%p189_p3), %vm264_vm2, %v1162_v5  ;;  %276 = vst.msk [vmem:[#allocation2 + $0x58] sm:$0xff] (!%p189_p3), %vm264_vm2, %v1162_v5  ;;  %1056 = vmatpush3.bf16.msra.mxu0 (!%p189_p3), %v510_v6  ;;  %1092 = vmatpush3.bf16.msra.mxu1 (!%p189_p3), %v510_v6 }
   0xe   : > { %277 = vst.msk [vmem:[#allocation2 + $0x60] sm:$0xff] %vm264_vm2, %v1162_v5  ;;  %278 = vst.msk [vmem:[#allocation2 + $0x68] sm:$0xff] %vm264_vm2, %v1162_v5  ;;  %s1450_s20 = smov (!%p1212_p4, %s994_s20), 63 }
   0xf   : > { %279 = vst.msk [vmem:[#allocation2 + $0x70] sm:$0xff] %vm264_vm2, %v1162_v5  ;;  %280 = vst.msk [vmem:[#allocation2 + $0x78] sm:$0xff] %vm264_vm2, %v1162_v5  ;;  %s995_s22 = sshll.u32 %s1450_s20, 2  ;;  %v299_v23 = vld [vmem:[#allocation2 + $0x10] sm:$0xff]  ;;  %v297_v25 = vld [vmem:[#allocation2] sm:$0xff]  ;;  %s997_s28 = sshll.u32 %s1450_s20, 3 }
  0x10   : > { %281 = vst.msk [vmem:[#allocation2 + $0x80] sm:$0xff] %vm264_vm2, %v1162_v5  ;;  %282 = vst.msk [vmem:[#allocation2 + $0x88] sm:$0xff] %vm264_vm2, %v1162_v5  ;;  %s1258_s25 = scalar_lea.vmem %s1440_s0, %s995_s22  ;;  %v300_v28 = vld [vmem:[#allocation2 + $0x18] sm:$0xff]  ;;  %v298_v33 = vld [vmem:[#allocation2 + $0x8] sm:$0xff]  ;;  %s1311_s4 = scalar_lea.vmem %s1443_s3, %s997_s28 }
  0x11   : > { %283 = vst.msk [vmem:[#allocation2 + $0x90] sm:$0xff] %vm264_vm2, %v1162_v5  ;;  %284 = vst.msk [vmem:[#allocation2 + $0x98] sm:$0xff] %vm264_vm2, %v1162_v5  ;;  %v1121_v7 = vld [vmem:[%s1258_s25] sm:$0xff]   ;;  %v1123_v9 = vld [vmem:[%s1258_s25 + $0x8] sm:$0xff]  }
  0x12   : > { %285 = vst.msk [vmem:[#allocation2 + $0xa0] sm:$0xff] %vm264_vm2, %v1162_v5  ;;  %286 = vst.msk [vmem:[#allocation2 + $0xa8] sm:$0xff] %vm264_vm2, %v1162_v5  ;;  %v1122_v8 = vld [vmem:[%s1258_s25 + $0x40] sm:$0xff]   ;;  %1057 = vmatprep.mubr.msk.bf16.mxu0 %vm456_vm3, %v1121_v7  ;;  %v1124_v10 = vld [vmem:[%s1258_s25 + $0x48] sm:$0xff]  }
  0x13   : > { %287 = vst.msk [vmem:[#allocation2 + $0xb0] sm:$0xff] %vm264_vm2, %v1162_v5  ;;  %288 = vst.msk [vmem:[#allocation2 + $0xb8] sm:$0xff] %vm264_vm2, %v1162_v5  ;;  %1073 = vmatprep.mubr.msk.bf16.mxu1 %vm456_vm3, %v1122_v8  ;;  %1058 = vmatmul.mubr.msk.bf16.vlgmr.msra.gmra.mrb[0].mxu0 %vm456_vm3, %v1123_v9  ;;  %v1125_v11 = vld [vmem:[%s1258_s25 + $0x10] sm:$0xff]   ;;  %v1127_v13 = vld [vmem:[%s1258_s25 + $0x18] sm:$0xff]  }
  0x14   : > { %289 = vst.msk [vmem:[#allocation2 + $0xc0] sm:$0xff] %vm264_vm2, %v1162_v5  ;;  %290 = vst.msk [vmem:[#allocation2 + $0xc8] sm:$0xff] %vm264_vm2, %v1162_v5  ;;  %1074 = vmatmul.mubr.msk.bf16.vlgmr.msra.gmra.mrb[0].mxu1 %vm456_vm3, %v1124_v10  ;;  %v1126_v12 = vld [vmem:[%s1258_s25 + $0x50] sm:$0xff]   ;;  %1061 = vmatprep.mubr.msk.bf16.mxu0 %vm456_vm3, %v1125_v11  ;;  %v1128_v14 = vld [vmem:[%s1258_s25 + $0x58] sm:$0xff]  }
  0x15   : > { %291 = vst.msk [vmem:[#allocation2 + $0xd0] sm:$0xff] %vm264_vm2, %v1162_v5  ;;  %292 = vst.msk [vmem:[#allocation2 + $0xd8] sm:$0xff] %vm264_vm2, %v1162_v5  ;;  %1077 = vmatprep.mubr.msk.bf16.mxu1 %vm456_vm3, %v1126_v12  ;;  %v1129_v15 = vld [vmem:[%s1258_s25 + $0x20] sm:$0xff]   ;;  %v1131_v17 = vld [vmem:[%s1258_s25 + $0x28] sm:$0xff]  }
  0x16   : > { %293 = vst.msk [vmem:[#allocation2 + $0xe0] sm:$0xff] %vm264_vm2, %v1162_v5  ;;  %294 = vst.msk [vmem:[#allocation2 + $0xe8] sm:$0xff] %vm264_vm2, %v1162_v5  ;;  %v1130_v16 = vld [vmem:[%s1258_s25 + $0x60] sm:$0xff]   ;;  %v1132_v18 = vld [vmem:[%s1258_s25 + $0x68] sm:$0xff]  }
  0x17   : > { %295 = vst.msk [vmem:[#allocation2 + $0xf0] sm:$0xff] %vm264_vm2, %v1162_v5  ;;  %296 = vst.msk [vmem:[#allocation2 + $0xf8] sm:$0xff] %vm264_vm2, %v1162_v5  ;;  %v1133_v19 = vld [vmem:[%s1258_s25 + $0x30] sm:$0xff]   ;;  %v1135_v21 = vld [vmem:[%s1258_s25 + $0x38] sm:$0xff]  }
  0x18   : > { %v1134_v20 = vld [vmem:[%s1258_s25 + $0x70] sm:$0xff]   ;;  %v1136_v22 = vld [vmem:[%s1258_s25 + $0x78] sm:$0xff]   ;;  %v313_v27 = vld [vmem:[#allocation2 + $0x80] sm:$0xff] }
  0x19   : > { %v315_v24 = vld [vmem:[#allocation2 + $0x90] sm:$0xff]  ;;  %v316_v32 = vld [vmem:[#allocation2 + $0x98] sm:$0xff]  ;;  %v314_v38 = vld [vmem:[#allocation2 + $0x88] sm:$0xff] }
  0x1a   : > { %v303_v47 = vld [vmem:[#allocation2 + $0x30] sm:$0xff]  ;;  %v301_v49 = vld [vmem:[#allocation2 + $0x20] sm:$0xff]  ;;  %v304_v53 = vld [vmem:[#allocation2 + $0x38] sm:$0xff] }
  0x1b   : > { %1062 = vmatmul.mubr.msk.bf16.gmra.mrb[4].mxu0 %vm456_vm3, %v1127_v13  ;;  %v319_v48 = vld [vmem:[#allocation2 + $0xb0] sm:$0xff]  ;;  %v317_v52 = vld [vmem:[#allocation2 + $0xa0] sm:$0xff]  ;;  %v320_v57 = vld [vmem:[#allocation2 + $0xb8] sm:$0xff] }
  0x1c   : > { %1078 = vmatmul.mubr.msk.bf16.gmra.mrb[4].mxu1 %vm456_vm3, %v1128_v14  ;;  %1065 = vmatprep.mubr.msk.bf16.mxu0 %vm456_vm3, %v1129_v15  ;;  %v302_v58 = vld [vmem:[#allocation2 + $0x28] sm:$0xff] }
  0x1d   : > { %1081 = vmatprep.mubr.msk.bf16.mxu1 %vm456_vm3, %v1130_v16  ;;  %v318_v0 = vld [vmem:[#allocation2 + $0xa8] sm:$0xff] }
  0x23   : > { %1066 = vmatmul.mubr.msk.bf16.gmra.mrb[8].mxu0 %vm456_vm3, %v1131_v17 }
  0x24   : > { %1082 = vmatmul.mubr.msk.bf16.gmra.mrb[8].mxu1 %vm456_vm3, %v1132_v18  ;;  %1069 = vmatprep.mubr.msk.bf16.mxu0 %vm456_vm3, %v1133_v19 }
  0x25   : > { %1085 = vmatprep.mubr.msk.bf16.mxu1 %vm456_vm3, %v1134_v20 }
  0x2b   : > { %1070 = vmatmul.mubr.msk.bf16.gmra.mrb[12].mxu0 %vm456_vm3, %v1135_v21 }
  0x2c   : > { %1086 = vmatmul.mubr.msk.bf16.gmra.mrb[12].mxu1 %vm456_vm3, %v1136_v22 }
  0xe6   : > { %v1059_v26 = vpop.f32.mrb[0].mxu0 }
  0xe7   : > { %v675_v29 = vadd.f32 %v1059_v26, %v299_v23  ;;  %v1075_v30 = vpop.f32.mrb[0].mxu1  ;;  %v546_v31 = vpop.f32.mrb[1].mxu0  ;;  %v307_v26 = vld [vmem:[#allocation2 + $0x50] sm:$0xff] }
  0xe8   : > { %v691_v34 = vadd.f32 %v1075_v30, %v315_v24  ;;  %v673_v35 = vadd.f32 %v546_v31, %v297_v25  ;;  %v610_v36 = vpop.f32.mrb[1].mxu1  ;;  %v1060_v37 = vpop.f32.mrb[2].mxu0  ;;  %v323_v30 = vld [vmem:[#allocation2 + $0xd0] sm:$0xff]  ;;  %v305_v31 = vld [vmem:[#allocation2 + $0x40] sm:$0xff] }
  0xe9   : > { %708 = vst.msk [vmem:[#allocation2 + $0x10] sm:$0xff] %vm264_vm2, %v675_v29  ;;  %v689_v39 = vadd.f32 %v610_v36, %v313_v27  ;;  %v676_v40 = vadd.f32 %v1060_v37, %v300_v28  ;;  %v1076_v41 = vpop.f32.mrb[2].mxu1  ;;  %v549_v42 = vpop.f32.mrb[3].mxu0  ;;  %v308_v36 = vld [vmem:[#allocation2 + $0x58] sm:$0xff] }
  0xea   : > { %724 = vst.msk [vmem:[#allocation2 + $0x90] sm:$0xff] %vm264_vm2, %v691_v34  ;;  %706 = vst.msk [vmem:[#allocation2] sm:$0xff] %vm264_vm2, %v673_v35  ;;  %v692_v43 = vadd.f32 %v1076_v41, %v316_v32  ;;  %v674_v44 = vadd.f32 %v549_v42, %v298_v33  ;;  %v613_v45 = vpop.f32.mrb[3].mxu1  ;;  %v321_v35 = vld [vmem:[#allocation2 + $0xc0] sm:$0xff]  ;;  %v324_v41 = vld [vmem:[#allocation2 + $0xd8] sm:$0xff] }
  0xeb   : > { %722 = vst.msk [vmem:[#allocation2 + $0x80] sm:$0xff] %vm264_vm2, %v689_v39  ;;  %709 = vst.msk [vmem:[#allocation2 + $0x18] sm:$0xff] %vm264_vm2, %v676_v40  ;;  %v690_v46 = vadd.f32 %v613_v45, %v314_v38  ;;  %v306_v42 = vld [vmem:[#allocation2 + $0x48] sm:$0xff] }
  0xec   : > { %725 = vst.msk [vmem:[#allocation2 + $0x98] sm:$0xff] %vm264_vm2, %v692_v43  ;;  %707 = vst.msk [vmem:[#allocation2 + $0x8] sm:$0xff] %vm264_vm2, %v674_v44 }
  0xed   : > { %723 = vst.msk [vmem:[#allocation2 + $0x88] sm:$0xff] %vm264_vm2, %v690_v46 }
  0xee   : > { %v1063_v51 = vpop.f32.mrb[4].mxu0 }
  0xef   : > { %v679_v54 = vadd.f32 %v1063_v51, %v303_v47  ;;  %v1079_v55 = vpop.f32.mrb[4].mxu1  ;;  %v562_v56 = vpop.f32.mrb[5].mxu0 }
  0xf0   : > { %v743_v59 = vld [vmem:[#allocation2 + $0x10] sm:$0xff]  ;;  %v695_v60 = vadd.f32 %v1079_v55, %v319_v48  ;;  %v677_v61 = vadd.f32 %v562_v56, %v301_v49  ;;  %v626_v62 = vpop.f32.mrb[5].mxu1  ;;  %v1064_v63 = vpop.f32.mrb[6].mxu0  ;;  %v322_v48 = vld [vmem:[#allocation2 + $0xc8] sm:$0xff] }
  0xf1   : > { %v782_v1 = vadd.f32 %v1303_v50, %v743_v59  ;;  %v759_v2 = vld [vmem:[#allocation2 + $0x90] sm:$0xff]  ;;  %v741_v3 = vld [vmem:[#allocation2] sm:$0xff]  ;;  %712 = vst.msk [vmem:[#allocation2 + $0x30] sm:$0xff] %vm264_vm2, %v679_v54  ;;  %v693_v4 = vadd.f32 %v626_v62, %v317_v52  ;;  %v680_v5 = vadd.f32 %v1064_v63, %v304_v53  ;;  %v1080_v6 = vpop.f32.mrb[6].mxu1  ;;  %v565_v7 = vpop.f32.mrb[7].mxu0 }
  0xf2   : > { %v798_v8 = vadd.f32 %v1303_v50, %v759_v2  ;;  %v780_v9 = vadd.f32 %v1303_v50, %v741_v3  ;;  %v757_v10 = vld [vmem:[#allocation2 + $0x80] sm:$0xff]  ;;  %v744_v11 = vld [vmem:[#allocation2 + $0x18] sm:$0xff]  ;;  %728 = vst.msk [vmem:[#allocation2 + $0xb0] sm:$0xff] %vm264_vm2, %v695_v60  ;;  %710 = vst.msk [vmem:[#allocation2 + $0x20] sm:$0xff] %vm264_vm2, %v677_v61  ;;  %v696_v12 = vadd.f32 %v1080_v6, %v320_v57  ;;  %v629_v14 = vpop.f32.mrb[7].mxu1 }
  0xf3   : > { %v678_v13 = vadd.f32 %v565_v7, %v302_v58  ;;  %v814_v15 = vmax.f32 %v782_v1, 0.0  ;;  %v796_v16 = vadd.f32 %v1303_v50, %v757_v10  ;;  %v783_v17 = vadd.f32 %v1303_v50, %v744_v11  ;;  %v760_v18 = vld [vmem:[#allocation2 + $0x98] sm:$0xff]  ;;  %v742_v19 = vld [vmem:[#allocation2 + $0x8] sm:$0xff]  ;;  %726 = vst.msk [vmem:[#allocation2 + $0xa0] sm:$0xff] %vm264_vm2, %v693_v4  ;;  %713 = vst.msk [vmem:[#allocation2 + $0x38] sm:$0xff] %vm264_vm2, %v680_v5 }
  0xf4   : > { %v694_v20 = vadd.f32 %v629_v14, %v318_v0  ;;  %v830_v21 = vmax.f32 %v798_v8, 0.0  ;;  %v812_v22 = vmax.f32 %v780_v9, 0.0  ;;  %v799_v23 = vadd.f32 %v1303_v50, %v760_v18  ;;  %v758_v25 = vld [vmem:[#allocation2 + $0x88] sm:$0xff]  ;;  %729 = vst.msk [vmem:[#allocation2 + $0xb8] sm:$0xff] %vm264_vm2, %v696_v12  ;;  %v311_v11 = vld [vmem:[#allocation2 + $0x70] sm:$0xff] }
  0xf5   : > { %v781_v24 = vadd.f32 %v1303_v50, %v742_v19  ;;  %711 = vst.msk [vmem:[#allocation2 + $0x28] sm:$0xff] %vm264_vm2, %v678_v13  ;;  %846 = vst.msk [vmem:[%s1311_s4 + $0x10] sm:$0xff] %vm264_vm2, %v814_v15  ;;  %v828_v27 = vmax.f32 %v796_v16, 0.0  ;;  %v815_v28 = vmax.f32 %v783_v17, 0.0  ;;  %v797_v29 = vadd.f32 %v1303_v50, %v758_v25  ;;  %v327_v15 = vld [vmem:[#allocation2 + $0xf0] sm:$0xff]  ;;  %v309_v16 = vld [vmem:[#allocation2 + $0x60] sm:$0xff] }
  0xf6   : > { %727 = vst.msk [vmem:[#allocation2 + $0xa8] sm:$0xff] %vm264_vm2, %v694_v20  ;;  %862 = vst.msk [vmem:[%s1311_s4 + $0x90] sm:$0xff] %vm264_vm2, %v830_v21  ;;  %v831_v32 = vmax.f32 %v799_v23, 0.0  ;;  %v1067_v34 = vpop.f32.mrb[8].mxu0  ;;  %v325_v20 = vld [vmem:[#allocation2 + $0xe0] sm:$0xff]  ;;  %v312_v21 = vld [vmem:[#allocation2 + $0x78] sm:$0xff] }
  0xf7   : > { %844 = vst.msk [vmem:[%s1311_s4] sm:$0xff] %vm264_vm2, %v812_v22  ;;  %v813_v33 = vmax.f32 %v781_v24, 0.0  ;;  %860 = vst.msk [vmem:[%s1311_s4 + $0x80] sm:$0xff] %vm264_vm2, %v828_v27  ;;  %v829_v37 = vmax.f32 %v797_v29, 0.0  ;;  %v683_v38 = vadd.f32 %v1067_v34, %v307_v26  ;;  %v1083_v39 = vpop.f32.mrb[8].mxu1  ;;  %v578_v40 = vpop.f32.mrb[9].mxu0 }
  0xf8   : > { %847 = vst.msk [vmem:[%s1311_s4 + $0x18] sm:$0xff] %vm264_vm2, %v815_v28  ;;  %863 = vst.msk [vmem:[%s1311_s4 + $0x98] sm:$0xff] %vm264_vm2, %v831_v32  ;;  %v747_v43 = vld [vmem:[#allocation2 + $0x30] sm:$0xff]  ;;  %v699_v44 = vadd.f32 %v1083_v39, %v323_v30  ;;  %v681_v45 = vadd.f32 %v578_v40, %v305_v31  ;;  %v642_v46 = vpop.f32.mrb[9].mxu1  ;;  %v1068_v47 = vpop.f32.mrb[10].mxu0  ;;  %v328_v26 = vld [vmem:[#allocation2 + $0xf8] sm:$0xff] }
  0xf9   : > { %845 = vst.msk [vmem:[%s1311_s4 + $0x8] sm:$0xff] %vm264_vm2, %v813_v33  ;;  %861 = vst.msk [vmem:[%s1311_s4 + $0x88] sm:$0xff] %vm264_vm2, %v829_v37  ;;  %v786_v49 = vadd.f32 %v1303_v50, %v747_v43  ;;  %v763_v51 = vld [vmem:[#allocation2 + $0xb0] sm:$0xff]  ;;  %v745_v52 = vld [vmem:[#allocation2 + $0x20] sm:$0xff]  ;;  %v697_v53 = vadd.f32 %v642_v46, %v321_v35  ;;  %v684_v54 = vadd.f32 %v1068_v47, %v308_v36  ;;  %v1084_v55 = vpop.f32.mrb[10].mxu1  ;;  %v581_v56 = vpop.f32.mrb[11].mxu0 }
  0xfa   : > { %716 = vst.msk [vmem:[#allocation2 + $0x50] sm:$0xff] %vm264_vm2, %v683_v38  ;;  %v802_v57 = vadd.f32 %v1303_v50, %v763_v51  ;;  %v784_v58 = vadd.f32 %v1303_v50, %v745_v52  ;;  %v761_v59 = vld [vmem:[#allocation2 + $0xa0] sm:$0xff]  ;;  %v748_v60 = vld [vmem:[#allocation2 + $0x38] sm:$0xff]  ;;  %732 = vst.msk [vmem:[#allocation2 + $0xd0] sm:$0xff] %vm264_vm2, %v699_v44  ;;  %v700_v61 = vadd.f32 %v1084_v55, %v324_v41  ;;  %v645_v63 = vpop.f32.mrb[11].mxu1 }
  0xfb   : > { %714 = vst.msk [vmem:[#allocation2 + $0x40] sm:$0xff] %vm264_vm2, %v681_v45  ;;  %v682_v62 = vadd.f32 %v581_v56, %v306_v42  ;;  %v818_v0 = vmax.f32 %v786_v49, 0.0  ;;  %v800_v1 = vadd.f32 %v1303_v50, %v761_v59  ;;  %v787_v2 = vadd.f32 %v1303_v50, %v748_v60  ;;  %v764_v3 = vld [vmem:[#allocation2 + $0xb8] sm:$0xff]  ;;  %730 = vst.msk [vmem:[#allocation2 + $0xc0] sm:$0xff] %vm264_vm2, %v697_v53  ;;  %v310_v27 = vld [vmem:[#allocation2 + $0x68] sm:$0xff] }
  0xfc   : > { %v746_v4 = vld [vmem:[#allocation2 + $0x28] sm:$0xff]  ;;  %717 = vst.msk [vmem:[#allocation2 + $0x58] sm:$0xff] %vm264_vm2, %v684_v54  ;;  %v698_v5 = vadd.f32 %v645_v63, %v322_v48  ;;  %v834_v6 = vmax.f32 %v802_v57, 0.0  ;;  %v816_v7 = vmax.f32 %v784_v58, 0.0  ;;  %v803_v8 = vadd.f32 %v1303_v50, %v764_v3  ;;  %733 = vst.msk [vmem:[#allocation2 + $0xd8] sm:$0xff] %vm264_vm2, %v700_v61 }
  0xfd   : > { %v785_v9 = vadd.f32 %v1303_v50, %v746_v4  ;;  %v762_v10 = vld [vmem:[#allocation2 + $0xa8] sm:$0xff]  ;;  %715 = vst.msk [vmem:[#allocation2 + $0x48] sm:$0xff] %vm264_vm2, %v682_v62  ;;  %850 = vst.msk [vmem:[%s1311_s4 + $0x30] sm:$0xff] %vm264_vm2, %v818_v0  ;;  %v832_v12 = vmax.f32 %v800_v1, 0.0  ;;  %v819_v13 = vmax.f32 %v787_v2, 0.0 }
  0xfe   : > { %v801_v14 = vadd.f32 %v1303_v50, %v762_v10  ;;  %731 = vst.msk [vmem:[#allocation2 + $0xc8] sm:$0xff] %vm264_vm2, %v698_v5  ;;  %866 = vst.msk [vmem:[%s1311_s4 + $0xb0] sm:$0xff] %vm264_vm2, %v834_v6  ;;  %v835_v17 = vmax.f32 %v803_v8, 0.0  ;;  %v1071_v19 = vpop.f32.mrb[12].mxu0  ;;  %v326_v33 = vld [vmem:[#allocation2 + $0xe8] sm:$0xff] }
  0xff   : > { %848 = vst.msk [vmem:[%s1311_s4 + $0x20] sm:$0xff] %vm264_vm2, %v816_v7  ;;  %v817_v18 = vmax.f32 %v785_v9, 0.0  ;;  %864 = vst.msk [vmem:[%s1311_s4 + $0xa0] sm:$0xff] %vm264_vm2, %v832_v12  ;;  %v687_v23 = vadd.f32 %v1071_v19, %v311_v11  ;;  %v1087_v24 = vpop.f32.mrb[12].mxu1  ;;  %v594_v25 = vpop.f32.mrb[13].mxu0 }
 0x100   : > { %851 = vst.msk [vmem:[%s1311_s4 + $0x38] sm:$0xff] %vm264_vm2, %v819_v13  ;;  %v833_v22 = vmax.f32 %v801_v14, 0.0  ;;  %867 = vst.msk [vmem:[%s1311_s4 + $0xb8] sm:$0xff] %vm264_vm2, %v835_v17  ;;  %v703_v29 = vadd.f32 %v1087_v24, %v327_v15  ;;  %v685_v30 = vadd.f32 %v594_v25, %v309_v16  ;;  %v658_v31 = vpop.f32.mrb[13].mxu1  ;;  %v1072_v32 = vpop.f32.mrb[14].mxu0 }
 0x101   : > { %849 = vst.msk [vmem:[%s1311_s4 + $0x28] sm:$0xff] %vm264_vm2, %v817_v18  ;;  %v751_v28 = vld [vmem:[#allocation2 + $0x50] sm:$0xff]  ;;  %720 = vst.msk [vmem:[#allocation2 + $0x70] sm:$0xff] %vm264_vm2, %v687_v23  ;;  %v701_v37 = vadd.f32 %v658_v31, %v325_v20  ;;  %v688_v38 = vadd.f32 %v1072_v32, %v312_v21  ;;  %v1088_v39 = vpop.f32.mrb[14].mxu1  ;;  %v597_v40 = vpop.f32.mrb[15].mxu0 }
 0x102   : > { %865 = vst.msk [vmem:[%s1311_s4 + $0xa8] sm:$0xff] %vm264_vm2, %v833_v22  ;;  %v790_v34 = vadd.f32 %v1303_v50, %v751_v28  ;;  %v767_v35 = vld [vmem:[#allocation2 + $0xd0] sm:$0xff]  ;;  %v749_v36 = vld [vmem:[#allocation2 + $0x40] sm:$0xff]  ;;  %736 = vst.msk [vmem:[#allocation2 + $0xf0] sm:$0xff] %vm264_vm2, %v703_v29  ;;  %v704_v45 = vadd.f32 %v1088_v39, %v328_v26  ;;  %v686_v46 = vadd.f32 %v597_v40, %v310_v27  ;;  %v661_v47 = vpop.f32.mrb[15].mxu1 }
 0x103   : > { %v806_v41 = vadd.f32 %v1303_v50, %v767_v35  ;;  %v788_v42 = vadd.f32 %v1303_v50, %v749_v36  ;;  %v765_v43 = vld [vmem:[#allocation2 + $0xc0] sm:$0xff]  ;;  %v752_v44 = vld [vmem:[#allocation2 + $0x58] sm:$0xff]  ;;  %718 = vst.msk [vmem:[#allocation2 + $0x60] sm:$0xff] %vm264_vm2, %v685_v30  ;;  %734 = vst.msk [vmem:[#allocation2 + $0xe0] sm:$0xff] %vm264_vm2, %v701_v37  ;;  %v702_v54 = vadd.f32 %v661_v47, %v326_v33 }
 0x104   : > { %v822_v48 = vmax.f32 %v790_v34, 0.0  ;;  %v804_v49 = vadd.f32 %v1303_v50, %v765_v43  ;;  %v791_v51 = vadd.f32 %v1303_v50, %v752_v44  ;;  %v768_v52 = vld [vmem:[#allocation2 + $0xd8] sm:$0xff]  ;;  %v750_v53 = vld [vmem:[#allocation2 + $0x48] sm:$0xff]  ;;  %721 = vst.msk [vmem:[#allocation2 + $0x78] sm:$0xff] %vm264_vm2, %v688_v38  ;;  %737 = vst.msk [vmem:[#allocation2 + $0xf8] sm:$0xff] %vm264_vm2, %v704_v45 }
 0x105   : > { %v838_v55 = vmax.f32 %v806_v41, 0.0  ;;  %v820_v56 = vmax.f32 %v788_v42, 0.0  ;;  %v807_v57 = vadd.f32 %v1303_v50, %v768_v52  ;;  %v789_v58 = vadd.f32 %v1303_v50, %v750_v53  ;;  %v766_v59 = vld [vmem:[#allocation2 + $0xc8] sm:$0xff]  ;;  %719 = vst.msk [vmem:[#allocation2 + $0x68] sm:$0xff] %vm264_vm2, %v686_v46  ;;  %735 = vst.msk [vmem:[#allocation2 + $0xe8] sm:$0xff] %vm264_vm2, %v702_v54 }
 0x106   : > { %854 = vst.msk [vmem:[%s1311_s4 + $0x50] sm:$0xff] %vm264_vm2, %v822_v48  ;;  %v836_v60 = vmax.f32 %v804_v49, 0.0  ;;  %v823_v61 = vmax.f32 %v791_v51, 0.0  ;;  %v805_v62 = vadd.f32 %v1303_v50, %v766_v59 }
 0x107   : > { %870 = vst.msk [vmem:[%s1311_s4 + $0xd0] sm:$0xff] %vm264_vm2, %v838_v55  ;;  %852 = vst.msk [vmem:[%s1311_s4 + $0x40] sm:$0xff] %vm264_vm2, %v820_v56  ;;  %v839_v63 = vmax.f32 %v807_v57, 0.0  ;;  %v821_v0 = vmax.f32 %v789_v58, 0.0 }
 0x108   : > { %868 = vst.msk [vmem:[%s1311_s4 + $0xc0] sm:$0xff] %vm264_vm2, %v836_v60  ;;  %855 = vst.msk [vmem:[%s1311_s4 + $0x58] sm:$0xff] %vm264_vm2, %v823_v61  ;;  %v837_v1 = vmax.f32 %v805_v62, 0.0  ;;  %v755_v2 = vld [vmem:[#allocation2 + $0x70] sm:$0xff] }
 0x109   : > { %871 = vst.msk [vmem:[%s1311_s4 + $0xd8] sm:$0xff] %vm264_vm2, %v839_v63  ;;  %853 = vst.msk [vmem:[%s1311_s4 + $0x48] sm:$0xff] %vm264_vm2, %v821_v0  ;;  %v794_v3 = vadd.f32 %v1303_v50, %v755_v2  ;;  %v771_v4 = vld [vmem:[#allocation2 + $0xf0] sm:$0xff] }
 0x10a   : > { %869 = vst.msk [vmem:[%s1311_s4 + $0xc8] sm:$0xff] %vm264_vm2, %v837_v1  ;;  %v753_v5 = vld [vmem:[#allocation2 + $0x60] sm:$0xff]  ;;  %v810_v6 = vadd.f32 %v1303_v50, %v771_v4 }
 0x10b   : > { %v792_v7 = vadd.f32 %v1303_v50, %v753_v5  ;;  %v769_v8 = vld [vmem:[#allocation2 + $0xe0] sm:$0xff]  ;;  %v756_v9 = vld [vmem:[#allocation2 + $0x78] sm:$0xff]  ;;  %v826_v10 = vmax.f32 %v794_v3, 0.0 }
 0x10c   : > { %v808_v11 = vadd.f32 %v1303_v50, %v769_v8  ;;  %v795_v12 = vadd.f32 %v1303_v50, %v756_v9  ;;  %v772_v13 = vld [vmem:[#allocation2 + $0xf8] sm:$0xff]  ;;  %v754_v14 = vld [vmem:[#allocation2 + $0x68] sm:$0xff]  ;;  %v842_v15 = vmax.f32 %v810_v6, 0.0 }
 0x10d   : > { %v824_v16 = vmax.f32 %v792_v7, 0.0  ;;  %v811_v17 = vadd.f32 %v1303_v50, %v772_v13  ;;  %v793_v18 = vadd.f32 %v1303_v50, %v754_v14  ;;  %v770_v19 = vld [vmem:[#allocation2 + $0xe8] sm:$0xff]  ;;  %858 = vst.msk [vmem:[%s1311_s4 + $0x70] sm:$0xff] %vm264_vm2, %v826_v10 }
 0x10e   : > { %v840_v20 = vmax.f32 %v808_v11, 0.0  ;;  %v827_v21 = vmax.f32 %v795_v12, 0.0  ;;  %v809_v22 = vadd.f32 %v1303_v50, %v770_v19  ;;  %874 = vst.msk [vmem:[%s1311_s4 + $0xf0] sm:$0xff] %vm264_vm2, %v842_v15 }
 0x10f   : > { %856 = vst.msk [vmem:[%s1311_s4 + $0x60] sm:$0xff] %vm264_vm2, %v824_v16  ;;  %v843_v23 = vmax.f32 %v811_v17, 0.0  ;;  %v825_v24 = vmax.f32 %v793_v18, 0.0 }
 0x110   : > { %872 = vst.msk [vmem:[%s1311_s4 + $0xe0] sm:$0xff] %vm264_vm2, %v840_v20  ;;  %859 = vst.msk [vmem:[%s1311_s4 + $0x78] sm:$0xff] %vm264_vm2, %v827_v21  ;;  %v841_v25 = vmax.f32 %v809_v22, 0.0 }
 0x111   : > { %875 = vst.msk [vmem:[%s1311_s4 + $0xf8] sm:$0xff] %vm264_vm2, %v843_v23  ;;  %857 = vst.msk [vmem:[%s1311_s4 + $0x68] sm:$0xff] %vm264_vm2, %v825_v24 }
 0x112   : > { %873 = vst.msk [vmem:[%s1311_s4 + $0xe8] sm:$0xff] %vm264_vm2, %v841_v25 }
 0x113 PF: > { %s13_s14 = sadd.s32 1, %s1159_s14   ;;  %s1445_s12 = smov %s1155_s13 }
 0x114   : > { %p10_p5 = scmp.ge.s32.totalorder %s13_s14, 4   ;;  %s1446_s13 = smov %s1448_s15 }
 0x116   :  { %12 = sbr.rel (!%p10_p5) target bundleno = 2 (0x2), region = 76 }

</bundles_post_ra>
